<compile_context>
chip_gen: v7x
topology: tpu7x:2x2x1
jax: 0.10.0
libtpu: 0.0.40
codegen_flags: <defaults>
</compile_context>

<pallas_src>
import math
from functools import partial

import jax
import jax.numpy as jnp
from jax.experimental import pallas as pl
from jax.experimental.pallas import tpu as pltpu


def _headpool_kernel(x_ref, w_ref, o_ref, *, K, GI, O):
    # x_ref: (s_tile, K*GI)   w_ref: (K, GI, O)   o_ref: (s_tile, K*O)
    # Small static unrolled loop over heads; each head is one MXU matmul with
    # M = s_tile (large), contraction = GI, N = O.
    for k in range(K):
        xk = x_ref[:, k * GI:(k + 1) * GI]
        acc = jnp.dot(xk, w_ref[k], preferred_element_type=jnp.float32)
        o_ref[:, k * O:(k + 1) * O] = acc.astype(o_ref.dtype)


def head_pooling_linear(x, weight, *, s_tile=512,
                        vmem_budget_bytes=32 * 1024 * 1024):
    """Pallas implementation of HeadPoolingLinear.forward.

    x: (S, K*G, I) or (B, S, K*G, I)
    weight: (K, G, I, O)
    returns: (S, K, O) or (B, S, K, O)
    """
    K, G, I, O = weight.shape
    GI = G * I

    if x.ndim == 3:
        S, H, I_x = x.shape
        batch_shape = None
        S_flat = S
    elif x.ndim == 4:
        B, S, H, I_x = x.shape
        batch_shape = (B, S)
        S_flat = B * S
    else:
        raise ValueError("x dim should be 3 or 4")
    assert H == K * G and I_x == I

    # Free views (no HBM data movement): merge contiguous trailing dims.
    x2 = x.reshape(S_flat, K * GI)
    w3 = weight.reshape(K, GI, O)

    x_elt = jnp.dtype(x.dtype).itemsize
    w_elt = jnp.dtype(weight.dtype).itemsize

    def vmem_need(st):
        # double-buffered x blocks + double-buffered out blocks + resident weight
        return (2 * st * K * GI * x_elt
                + 2 * st * K * O * x_elt
                + K * GI * O * w_elt)

    # Choose the seq tile: clamp to S_flat, keep it a multiple of 8 unless it
    # covers the whole (possibly ragged) S_flat, and shrink until it fits the
    # VMEM budget (conservative enough for v7x's 64 MiB physical VMEM).
    s_tile = min(s_tile, S_flat)
    if s_tile < S_flat:
        s_tile = max(8, (s_tile // 8) * 8)
    while s_tile > 8 and vmem_need(s_tile) > vmem_budget_bytes:
        new_tile = max(8, ((s_tile // 2) // 8) * 8)
        if new_tile == s_tile:
            break
        s_tile = new_tile

    grid = (pl.cdiv(S_flat, s_tile),)  # ragged last tile handled by Pallas masking

    vmem_limit = int(min(max(vmem_need(s_tile) + vmem_need(s_tile) // 2 + (2 << 20),
                             32 << 20),
                         56 << 20))

    cost = pl.CostEstimate(
        flops=2 * S_flat * K * GI * O,
        transcendentals=0,
        bytes_accessed=(S_flat * K * GI * x_elt
                        + S_flat * K * O * x_elt
                        + K * GI * O * w_elt),
    )

    out = pl.pallas_call(
        partial(_headpool_kernel, K=K, GI=GI, O=O),
        out_shape=jax.ShapeDtypeStruct((S_flat, K * O), x.dtype),
        grid_spec=pltpu.PrefetchScalarGridSpec(
            num_scalar_prefetch=0,
            grid=grid,
            in_specs=[
                # One lane-dense row slab per step (last dim == full array dim).
                pl.BlockSpec((s_tile, K * GI), lambda s: (s, 0)),
                # Full weight resident in VMEM; constant block index -> DMA'd once.
                pl.BlockSpec((K, GI, O), lambda s: (0, 0, 0)),
            ],
            # Full K*O slab per step: lane-dense store, no masked vst per head.
            out_specs=pl.BlockSpec((s_tile, K * O), lambda s: (s, 0)),
        ),
        compiler_params=pltpu.CompilerParams(
            dimension_semantics=("parallel",),   # seq tiles shard across TCs (v7x)
            vmem_limit_bytes=vmem_limit,
        ),
        cost_estimate=cost,
    )(x2, w3)

    # Free reshapes back to the PyTorch output layout.
    if batch_shape is None:
        return out.reshape(S_flat, K, O)
    return out.reshape(batch_shape[0], batch_shape[1], K, O)


def init_weight(key, num_k_head, gqa_group_size, model_hidden_size, gate_hidden_size):
    # xavier_uniform_ equivalent for a 4D tensor (K, G, I, O):
    # PyTorch: fan_in = G * (I*O), fan_out = K * (I*O); bound = sqrt(6/(fan_in+fan_out))
    receptive = model_hidden_size * gate_hidden_size
    fan_in = gqa_group_size * receptive
    fan_out = num_k_head * receptive
    bound = math.sqrt(6.0 / (fan_in + fan_out))
    return jax.random.uniform(
        key,
        (num_k_head, gqa_group_size, model_hidden_size, gate_hidden_size),
        dtype=jnp.float32,
        minval=-bound,
        maxval=bound,
    )


if __name__ == "__main__":
    key = jax.random.PRNGKey(0)
    k_x, k_w = jax.random.split(key)

    # Small shapes: B=2, S=8, K(num_k_head)=2, G(gqa_group)=4, I(model_hidden)=32,
    # O(gate_hidden)=16.  num_q_head = K*G = 8, contraction dim G*I = 128.
    B, S, K, G, I, O = 2, 8, 2, 4, 32, 16

    weight = init_weight(k_w, K, G, I, O)
    x4 = jax.random.normal(k_x, (B, S, K * G, I), dtype=jnp.float32)

    # 4D path
    out4 = jax.block_until_ready(head_pooling_linear(x4, weight))
    ref4 = jnp.einsum("bskgi,kgio->bsko", x4.reshape(B, S, K, G, I), weight)
    assert out4.shape == (B, S, K, O)
    assert jnp.allclose(out4, ref4, atol=1e-4, rtol=1e-4)

    # 3D path
    x3 = x4[0]  # (S, K*G, I)
    out3 = jax.block_until_ready(head_pooling_linear(x3, weight))
    ref3 = jnp.einsum("skgi,kgio->sko", x3.reshape(S, K, G, I), weight)
    assert out3.shape == (S, K, O)
    assert jnp.allclose(out3, ref3, atol=1e-4, rtol=1e-4)

    print("KERNEL_OK")
</pallas_src>

<mosaic_0001>
module attributes {stable_mosaic.version = 11 : i64} {
  func.func @_headpool_kernel(%arg0: i32, %arg1: memref<16x256xf32, #tpu.memory_space<vmem>>, %arg2: memref<2x128x16xf32, #tpu.memory_space<vmem>>, %arg3: memref<16x32xf32, #tpu.memory_space<vmem>>) attributes {dimension_semantics = [#tpu.dimension_semantics<parallel>], iteration_bounds = array<i64: 1>, scalar_prefetch = 0 : i64, scratch_operands = 0 : i64, tpu.core_type = #tpu.core_type<tc>, window_params = [{transform_indices = @transform_0, window_bounds = array<i64: 16, 256>}, {pipeline_mode = #tpu.pipeline_mode<synchronous>, transform_indices = @transform_1, window_bounds = array<i64: 2, 128, 16>}, {transform_indices = @transform_2, window_bounds = array<i64: 16, 32>}]} {
    %c0 = arith.constant 0 : index
    %c0_0 = arith.constant 0 : index
    %0 = vector.load %arg1[%c0, %c0_0] : memref<16x256xf32, #tpu.memory_space<vmem>>, vector<16x128xf32>
    %c0_1 = arith.constant 0 : index
    %c0_2 = arith.constant 0 : index
    %c0_3 = arith.constant 0 : index
    %1 = vector.load %arg2[%c0_1, %c0_2, %c0_3] : memref<2x128x16xf32, #tpu.memory_space<vmem>>, vector<1x128x16xf32>
    %2 = vector.shape_cast %1 : vector<1x128x16xf32> to vector<128x16xf32>
    %cst = arith.constant dense<0.000000e+00> : vector<16x16xf32>
    %3 = tpu.matmul %0, %2, %cst {dimension_numbers = #tpu.dot_dimension_numbers<[1], [0], [0], [1], [0, 0, 1, 1], [], []>} : vector<16x128xf32>, vector<128x16xf32>, vector<16x16xf32> -> vector<16x16xf32>
    %c0_4 = arith.constant 0 : index
    %c0_5 = arith.constant 0 : index
    %4 = vector.load %arg3[%c0_4, %c0_5] : memref<16x32xf32, #tpu.memory_space<vmem>>, vector<16x16xf32>
    tpu.vector_store %arg3[%c0_4, %c0_5], %3 {strides = array<i32>} : memref<16x32xf32, #tpu.memory_space<vmem>>, vector<16x16xf32>,
    %c0_6 = arith.constant 0 : index
    %c128 = arith.constant 128 : index
    %5 = vector.load %arg1[%c0_6, %c128] : memref<16x256xf32, #tpu.memory_space<vmem>>, vector<16x128xf32>
    %c1 = arith.constant 1 : index
    %c0_7 = arith.constant 0 : index
    %c0_8 = arith.constant 0 : index
    %6 = vector.load %arg2[%c1, %c0_7, %c0_8] : memref<2x128x16xf32, #tpu.memory_space<vmem>>, vector<1x128x16xf32>
    %7 = vector.shape_cast %6 : vector<1x128x16xf32> to vector<128x16xf32>
    %cst_9 = arith.constant dense<0.000000e+00> : vector<16x16xf32>
    %8 = tpu.matmul %5, %7, %cst_9 {dimension_numbers = #tpu.dot_dimension_numbers<[1], [0], [0], [1], [0, 0, 1, 1], [], []>} : vector<16x128xf32>, vector<128x16xf32>, vector<16x16xf32> -> vector<16x16xf32>
    %c0_10 = arith.constant 0 : index
    %c16 = arith.constant 16 : index
    %9 = vector.load %arg3[%c0_10, %c16] : memref<16x32xf32, #tpu.memory_space<vmem>>, vector<16x16xf32>
    tpu.vector_store %arg3[%c0_10, %c16], %8 {strides = array<i32>} : memref<16x32xf32, #tpu.memory_space<vmem>>, vector<16x16xf32>,
    return
  }
  func.func @transform_0(%arg0: i32) -> (i32, i32) {
    %c0_i32 = arith.constant 0 : i32
    %c0_i32_0 = arith.constant 0 : i32
    return %arg0, %c0_i32 : i32, i32
  }
  func.func @transform_1(%arg0: i32) -> (i32, i32, i32) {
    %c0_i32 = arith.constant 0 : i32
    %c0_i32_0 = arith.constant 0 : i32
    %c0_i32_1 = arith.constant 0 : i32
    %c0_i32_2 = arith.constant 0 : i32
    return %c0_i32, %c0_i32_0, %c0_i32_1 : i32, i32, i32
  }
  func.func @transform_2(%arg0: i32) -> (i32, i32) {
    %c0_i32 = arith.constant 0 : i32
    %c0_i32_0 = arith.constant 0 : i32
    return %arg0, %c0_i32 : i32, i32
  }
}

</mosaic_0001>

<bundles_post_ra>
// kernel: tpu_custom_call.1
= control target key start
LH: loop header
LB: loop body
LE: loop exit
PB: predicated region body
PF: predicated region fallthrough
CT: control target
= control target key end

     0   :  { %s582_s0 = inlined_call_operand.vmem [shape: f32[16,256], index: 0, kind: input, shape index: {}]   ;;  %s583_s1 = inlined_call_operand.vmem [shape: f32[2,128,16], index: 1, kind: input, shape index: {}]   ;;  %s584_s2 = inlined_call_operand.hbm [shape: f32[16,32], index: 2, kind: output, shape index: {}]  }
   0x1   :  { %v229_v0 = vld [vmem:[%s583_s1 + $0x80] sm:$0xff]  ;;  %v230_v1 = vld [vmem:[%s583_s1 + $0x88] sm:$0xff]  ;;  %v231_v2 = vld [vmem:[%s583_s1 + $0x90] sm:$0xff] }
   0x2   :  { %v383_v3 = vpack.c.bf16 %v230_v1, %v229_v0  ;;  %v232_v4 = vld [vmem:[%s583_s1 + $0x98] sm:$0xff]  ;;  %v233_v6 = vld [vmem:[%s583_s1 + $0xa0] sm:$0xff]  ;;  %v234_v7 = vld [vmem:[%s583_s1 + $0xa8] sm:$0xff] }
   0x3   :  { %v387_v5 = vpack.c.bf16 %v232_v4, %v231_v2  ;;  %v391_v8 = vpack.c.bf16 %v234_v7, %v233_v6  ;;  %v235_v9 = vld [vmem:[%s583_s1 + $0xb0] sm:$0xff]  ;;  %v236_v10 = vld [vmem:[%s583_s1 + $0xb8] sm:$0xff]  ;;  %v108_v11 = vld [vmem:[%s582_s0 + $0x8] sm:$0xff] }
   0x4   :  { %384 = vmatprep.subr.bf16.mxu1 %v383_v3  ;;  %348 = vmatprep.mubr.f32.mxu1 %v108_v11  ;;  %v14_v12 = vld [vmem:[%s583_s1] sm:$0xff]  ;;  %v15_v13 = vld [vmem:[%s583_s1 + $0x8] sm:$0xff]  ;;  %v16_v14 = vld [vmem:[%s583_s1 + $0x10] sm:$0xff]  ;;  %v395_v20 = vpack.c.bf16 %v236_v10, %v235_v9 }
   0x5   :  { %386 = vmatpush3.bf16.msra.mxu1 %v383_v3  ;;  %v351_v15 = vpack.c.bf16 %v15_v13, %v14_v12  ;;  %v17_v16 = vld [vmem:[%s583_s1 + $0x18] sm:$0xff]  ;;  %v18_v18 = vld [vmem:[%s583_s1 + $0x20] sm:$0xff]  ;;  %v19_v19 = vld [vmem:[%s583_s1 + $0x28] sm:$0xff] }
   0x6   :  { %388 = vmatprep.subr.bf16.mxu1 %v387_v5  ;;  %v355_v17 = vpack.c.bf16 %v17_v16, %v16_v14  ;;  %v237_v21 = vld [vmem:[%s583_s1 + $0xc0] sm:$0xff]  ;;  %v238_v22 = vld [vmem:[%s583_s1 + $0xc8] sm:$0xff]  ;;  %v359_v23 = vpack.c.bf16 %v19_v19, %v18_v18  ;;  %v20_v25 = vld [vmem:[%s583_s1 + $0x30] sm:$0xff] }
   0x7   :  { %352 = vmatprep.subr.bf16.mxu0 %v351_v15  ;;  %v12_v24 = vld [vmem:[%s582_s0] sm:$0xff]  ;;  %v21_v26 = vld [vmem:[%s583_s1 + $0x38] sm:$0xff] }
   0x8   :  { %354 = vmatpush3.bf16.msra.mxu0 %v351_v15  ;;  %313 = vmatprep.mubr.f32.mxu0 %v12_v24 }
   0x9   :  { %390 = vmatpush3.bf16.msra.mxu1 %v387_v5  ;;  %356 = vmatprep.subr.bf16.mxu0 %v355_v17 }
   0xa   :  { %392 = vmatprep.subr.bf16.mxu1 %v391_v8 }
   0xd   :  { %394 = vmatpush3.bf16.msra.mxu1 %v391_v8 }
   0xe   :  { %7 = vsyncpa [#allocation3], 0  ;;  %396 = vmatprep.subr.bf16.mxu1 %v395_v20  ;;  %v399_v27 = vpack.c.bf16 %v238_v22, %v237_v21  ;;  %v239_v28 = vld [vmem:[%s583_s1 + $0xd0] sm:$0xff]  ;;  %v240_v29 = vld [vmem:[%s583_s1 + $0xd8] sm:$0xff]  ;;  %358 = vmatpush3.bf16.msra.mxu0 %v355_v17  ;;  %v363_v30 = vpack.c.bf16 %v21_v26, %v20_v25  ;;  %vm105_vm0 = vcmask 130048   ;;  %vm210_vm1 = vcmask 261248  }
   0xf   :  { %360 = vmatprep.subr.bf16.mxu0 %v359_v23  ;;  %v22_v31 = vld [vmem:[%s583_s1 + $0x40] sm:$0xff]  ;;  %v23_v32 = vld [vmem:[%s583_s1 + $0x48] sm:$0xff]  ;;  %v403_v33 = vpack.c.bf16 %v240_v29, %v239_v28  ;;  %v24_v37 = vld [vmem:[%s583_s1 + $0x50] sm:$0xff]  ;;  %s444_s25 = smov [#allocation2]  }
  0x10   :  { %v241_v34 = vld [vmem:[%s583_s1 + $0xe0] sm:$0xff]  ;;  %v242_v35 = vld [vmem:[%s583_s1 + $0xe8] sm:$0xff]  ;;  %v367_v36 = vpack.c.bf16 %v23_v32, %v22_v31  ;;  %v25_v38 = vld [vmem:[%s583_s1 + $0x58] sm:$0xff]  ;;  %s218_s26 = sshll.u32 %s444_s25, 4  ;;  %s219_s26 = int_to_ptr.vmem [resolvable:$true] %s218_s26 }
  0x11   :  { %398 = vmatpush3.bf16.msra.mxu1 %v395_v20  ;;  %v407_v39 = vpack.c.bf16 %v242_v35, %v241_v34  ;;  %v243_v40 = vld [vmem:[%s583_s1 + $0xf0] sm:$0xff]  ;;  %v244_v41 = vld [vmem:[%s583_s1 + $0xf8] sm:$0xff]  ;;  %v371_v42 = vpack.c.bf16 %v25_v38, %v24_v37  ;;  %v26_v43 = vld [vmem:[%s583_s1 + $0x60] sm:$0xff]  ;;  %p424_p1 = scmp.lt.s32.totalorder %s219_s26, %s219_s26 }
  0x12   :  { %400 = vmatprep.subr.bf16.mxu1 %v399_v27  ;;  %362 = vmatpush3.bf16.msra.mxu0 %v359_v23  ;;  %v27_v44 = vld [vmem:[%s583_s1 + $0x68] sm:$0xff]  ;;  %v411_v45 = vpack.c.bf16 %v244_v41, %v243_v40  ;;  %v28_v47 = vld [vmem:[%s583_s1 + $0x70] sm:$0xff]  ;;  %v29_v48 = vld [vmem:[%s583_s1 + $0x78] sm:$0xff]  ;;  %s443_s1 = smov 16  }
  0x13   :  { %364 = vmatprep.subr.bf16.mxu0 %v363_v30  ;;  %v375_v46 = vpack.c.bf16 %v27_v44, %v26_v43  ;;  %v379_v49 = vpack.c.bf16 %v29_v48, %v28_v47  ;;  %v109_v50 = vld [vmem:[%s582_s0 + $0x18] sm:$0xff]  ;;  %v13_v51 = vld [vmem:[%s582_s0 + $0x10] sm:$0xff]  ;;  %s419_s0 = scalar_lea.vmem %s219_s26, 256 }
  0x14   :  { %p420_p0 = scmp.ne.s32.totalorder %s219_s26, %s419_s0  ;;  %p425_p2 = scmp.lt.s32.totalorder %s419_s0, %s419_s0 }
  0x15   :  { %402 = vmatpush3.bf16.msra.mxu1 %v399_v27 }
  0x16   :  { %404 = vmatprep.subr.bf16.mxu1 %v403_v33  ;;  %366 = vmatpush3.bf16.msra.mxu0 %v363_v30  ;;  %p426_p3 = por %p425_p2, %p424_p1 }
  0x17   :  { %368 = vmatprep.subr.bf16.mxu0 %v367_v36 }
  0x18   :  { %p427_p4 = pnand %p426_p3, %p420_p0 }
  0x19   :  { %406 = vmatpush3.bf16.msra.mxu1 %v403_v33 }
  0x1a   :  { %408 = vmatprep.subr.bf16.mxu1 %v407_v39  ;;  %370 = vmatpush3.bf16.msra.mxu0 %v367_v36 }
  0x1b   :  { %372 = vmatprep.subr.bf16.mxu0 %v371_v42 }
  0x1d   :  { %410 = vmatpush3.bf16.msra.mxu1 %v407_v39 }
  0x1e   :  { %412 = vmatprep.subr.bf16.mxu1 %v411_v45  ;;  %374 = vmatpush3.bf16.msra.mxu0 %v371_v42 }
  0x1f   :  { %376 = vmatprep.subr.bf16.mxu0 %v375_v46 }
  0x21   :  { %414 = vmatpush3.bf16.msra.mxu1 %v411_v45 }
  0x22   :  { %378 = vmatpush3.bf16.msra.mxu0 %v375_v46 }
  0x23   :  { %380 = vmatprep.subr.bf16.mxu0 %v379_v49 }
  0x24   :  { %349 = vmatmul.mubr.f32.vlgmr.msra.gmra.mrb[0].mxu1 %v109_v50 }
  0x26   :  { %382 = vmatpush3.bf16.msra.mxu0 %v379_v49 }
  0x29   :  { %314 = vmatmul.mubr.f32.vlgmr.msra.gmra.mrb[0].mxu0 %v13_v51 }
  0xf7   :  { %v350_v52 = vpop.f32.mrb[0].mxu1 }
  0xf8   :  { %v193_v53 = vpop.f32.mrb[1].mxu1 }
  0xf9   :  { %204 = vrot.lane.b32.xlu0 %v193_v53, %s443_s1 }
  0xfc   :  { %v315_v54 = vpop.f32.mrb[0].mxu0 }
  0xfd   :  { %206 = vrot.lane.b32.xlu0 %v350_v52, %s443_s1  ;;  %107 = vst.msk [vmem:[#allocation2 + $0x8] sm:$0xff] %vm105_vm0, %v315_v54  ;;  %v96_v55 = vpop.f32.mrb[1].mxu0 }
  0xfe   :  { %106 = vst.msk [vmem:[#allocation2] sm:$0xff] %vm105_vm0, %v96_v55 }
 0x16b   :  { %v205_v56 = vpop.permute.xlu0 %204 }
 0x16c   :  { %211 = vst.msk [vmem:[#allocation2] sm:$0xff] %vm210_vm1, %v205_v56 }
 0x16f   :  { %v207_v57 = vpop.permute.xlu0 %206 }
 0x170   :  { %212 = vst.msk [vmem:[#allocation2 + $0x8] sm:$0xff] %vm210_vm1, %v207_v57 }
 0x171   :  { %430 = shalt.err (!%p427_p4)
}
 0x172   :  { %s431_s29 = scalar_lea.hbm %s584_s2, 256 }
 0x173   :  { %p432_p5 = scmp.ne.s32.totalorder %s584_s2, %s431_s29  ;;  %p435_p6 = scmp.lt.u32.totalorder %s431_s29, %s584_s2 }
 0x175   :  { %p437_p7 = pnand %p435_p6, %p432_p5 }
 0x177   :  { %440 = shalt.err (!%p437_p7)
}
 0x178   :  { %s445_s6 = smov 128   ;;  %s446_s7 = smov 8  }
 0x179   :  { %224 = dma.vmem_to_hbm [thread:$0]  %s219_s26, 256, %s584_s2, [#allocation3], %s445_s6, %s445_s6, %s446_s7  }
 0x17a   :  { %441 = dma.done.wait [#allocation3], 256  }
 0x17b   :  { %442 = vsyncadd [#allocation3], 4294967040 }
 0x17c   :  { %228 = vsyncpa [#allocation3], 1 }

</bundles_post_ra>
